<compile_context>
chip_gen: v5e
topology: v5e:2x2
jax: 0.10.0
libtpu: 0.0.40
codegen_flags: <defaults>
</compile_context>

<pallas_src>
import warnings

import jax
import jax.numpy as jnp
from jax.experimental import pallas as pl
from jax.experimental.pallas import tpu as pltpu


def _mask_bool_kernel(m_ref, o_ref):
    # mask.bool(): nonzero -> True. Written directly as bool so the cast is
    # fused into the kernel (no extra HBM read/write pass outside).
    o_ref[...] = m_ref[...] != 0


@jax.jit
def _mask_to_bool(mask):
    """mask.bool() (nonzero -> True) with a lane-dense Pallas kernel.

    mask: (B, 1, L) of any numeric/bool dtype -> (B, 1, L) bool.
    """
    B, one, L = mask.shape
    R = B * one
    m2d = mask.reshape(R, L)  # lane-dense 2D layout: R rows x L lanes

    elem_bytes = jnp.dtype(mask.dtype).itemsize
    total_bytes = R * L * elem_bytes

    # Only tile when the mask is large; otherwise use one full-array block
    # (single grid point -> minimal launch overhead, unmasked full-width stores).
    if total_bytes > (4 << 20) and R % 8 == 0 and L % 128 == 0:
        tile_r = 8
        while (tile_r * 2 <= R
               and R % (tile_r * 2) == 0
               and tile_r * 2 * L * elem_bytes <= (1 << 20)):
            tile_r *= 2
        out2d = pl.pallas_call(
            _mask_bool_kernel,
            out_shape=jax.ShapeDtypeStruct((R, L), jnp.bool_),
            grid=(R // tile_r,),
            in_specs=[pl.BlockSpec((tile_r, L), lambda i: (i, 0))],
            out_specs=pl.BlockSpec((tile_r, L), lambda i: (i, 0)),
            compiler_params=pltpu.CompilerParams(
                dimension_semantics=("parallel",)),
        )(m2d)
    else:
        # Full array as a single block (block_shape == array shape is always
        # layout-legal); one grid point, no per-batch launch overhead.
        out2d = pl.pallas_call(
            _mask_bool_kernel,
            out_shape=jax.ShapeDtypeStruct((R, L), jnp.bool_),
        )(m2d)

    return out2d.reshape(B, one, L)


class SequenceTrimmer:
    """JAX/Pallas port of weaver's SequenceTrimmer (no learnable parameters)."""

    def __init__(self, enabled=False, target=(0.9, 1.02)):
        self.enabled = enabled
        self.target = target
        self._counter = 0

    def __call__(self, x, v=None, mask=None, uu=None):
        if mask is None:
            # torch.ones_like(x[:, :1]).bool() is a compile-time constant:
            # let XLA constant-fold it instead of launching a kernel.
            B, _, L = x.shape
            mask = jnp.ones((B, 1, L), dtype=jnp.bool_)
        else:
            mask = _mask_to_bool(mask)

        if self.enabled:
            if self._counter < 5:
                self._counter += 1
            else:
                warnings.warn(
                    "SequenceTrimmer(enabled=True) trimming branch is not "
                    "implemented in the Pallas port; returning untrimmed "
                    "sequences.")
            # TODO(synk): trimming branch (quantile / argsort / gather / dynamic
            # slice) omitted: data-dependent output shapes, no static Pallas
            # equivalent.

        return x, v, mask, uu


if __name__ == "__main__":
    key = jax.random.PRNGKey(0)
    kx, kv, km = jax.random.split(key, 3)

    B, C, CV, L = 2, 4, 4, 128  # small shapes; L lane-aligned (128)
    x = jax.random.normal(kx, (B, C, L), dtype=jnp.float32)
    v = jax.random.normal(kv, (B, CV, L), dtype=jnp.float32)
    # a float "mask" with zeros and non-zeros (like a padding mask)
    mask_in = (jax.random.uniform(km, (B, 1, L)) > 0.3).astype(jnp.float32)

    trimmer = SequenceTrimmer(enabled=False)

    # Path 1: mask is None -> ones mask (constant, no kernel)
    x1, v1, m1, uu1 = trimmer(x, v=v, mask=None, uu=None)
    jax.block_until_ready((x1, v1, m1))
    assert m1.shape == (B, 1, L) and m1.dtype == jnp.bool_
    assert bool(jnp.all(m1))
    assert bool(jnp.allclose(x1, x)) and bool(jnp.allclose(v1, v)) and uu1 is None

    # Path 2: mask provided -> .bool() conversion via Pallas kernel
    x2, v2, m2, uu2 = trimmer(x, v=v, mask=mask_in, uu=None)
    jax.block_until_ready((x2, v2, m2))
    ref_mask = (mask_in != 0)
    assert m2.dtype == jnp.bool_
    assert bool(jnp.array_equal(m2, ref_mask))
    assert bool(jnp.allclose(x2, x)) and bool(jnp.allclose(v2, v)) and uu2 is None

    print("KERNEL_OK")
</pallas_src>

<mosaic_0001>
module attributes {stable_mosaic.version = 11 : i64} {
  func.func @_mask_bool_kernel(%arg0: memref<2x128xf32, #tpu.memory_space<vmem>>, %arg1: memref<2x128xi32, #tpu.memory_space<vmem>>) attributes {dimension_semantics = [], scalar_prefetch = 0 : i64, scratch_operands = 0 : i64, tpu.core_type = #tpu.core_type<tc>} {
    %c0 = arith.constant 0 : index
    %c0_0 = arith.constant 0 : index
    %0 = vector.load %arg0[%c0, %c0_0] : memref<2x128xf32, #tpu.memory_space<vmem>>, vector<2x128xf32>
    %cst = arith.constant 0.000000e+00 : f32
    %1 = vector.broadcast %cst : f32 to vector<2x128xf32>
    %2 = arith.cmpf one, %0, %1 : vector<2x128xf32>
    %c0_1 = arith.constant 0 : index
    %c0_2 = arith.constant 0 : index
    %3 = vector.load %arg1[%c0_1, %c0_2] : memref<2x128xi32, #tpu.memory_space<vmem>>, vector<2x128xi32>
    %4 = arith.extui %2 : vector<2x128xi1> to vector<2x128xi32>
    %cst_3 = arith.constant dense<0> : vector<2x128xi32>
    %5 = arith.cmpi ne, %3, %cst_3 : vector<2x128xi32>
    tpu.vector_store %arg1[%c0_1, %c0_2], %4 {strides = array<i32>} : memref<2x128xi32, #tpu.memory_space<vmem>>, vector<2x128xi32>,
    return
  }
}

</mosaic_0001>

<bundles_post_ra>
// kernel: _mask_to_bool.1
= control target key start
LH: loop header
LB: loop body
LE: loop exit
PB: predicated region body
PF: predicated region fallthrough
CT: control target
= control target key end

     0   :  { %6 = vsyncpa [#allocation3], 0  ;;  %s59_s9 = smov [#allocation2]   ;;  %s77_s0 = inlined_call_operand.hbm [shape: f32[2,128], index: 0, kind: input, shape index: {}]   ;;  %s78_s1 = inlined_call_operand.vmem [shape: s32[2,128], index: 1, kind: output, shape index: {}]  }
   0x1   :  { %s12_s8 = sshll.u32 %s77_s0, 4  ;;  %s14_s10 = sshll.u32 %s59_s9, 4  ;;  %s13_s8 = int_to_ptr.hbm [resolvable:$true] %s12_s8  ;;  %s15_s10 = int_to_ptr.vmem [resolvable:$true] %s14_s10 }
   0x2   :  { %17 = dma.hbm_to_vmem [thread:$0]  %s13_s8, 32, %s15_s10, [#allocation3]  }
   0x3   :  { %57 = dma.done.wait [#allocation3], 32  }
   0x4   :  { %58 = vsyncadd [#allocation3], 4294967264  ;;  %v22_v0 = vld [vmem:[#allocation2] sm:$0x3]  ;;  %v60_v1 = vmov 0  }
   0x5   :  { %vm23_vm0 = vcmp.ne.f32.partialorder %v22_v0, 0.0 }
   0x6   :  { %v24_v2 = vsel %vm23_vm0, 1, %v60_v1 }
   0x7   :  { %25 = vst [vmem:[%s78_s1] sm:$0x3] %v24_v2 }
   0x8   :  { %30 = vsyncpa [#allocation3], 1 }

</bundles_post_ra>
